<compile_context>
chip_gen: v5e
topology: v5e:2x2
jax: 0.10.0
libtpu: 0.0.40
codegen_flags: <defaults>
</compile_context>

<pallas_src>
import functools

import jax
import jax.numpy as jnp
from jax.experimental import pallas as pl
from jax.experimental.pallas import tpu as pltpu

_LANE = 128
_SUBLANE = 8


def _round_up(x, m):
    return ((x + m - 1) // m) * m


# -----------------------------------------------------------------------------
# Single-pass kernel: GAP -> MLP -> sigmoid -> scale, one batch tile per step.
# -----------------------------------------------------------------------------
def _ca_single_pass_kernel(x_ref, w1_ref, b1_ref, w2_ref, b2_ref, o_ref, *, inv_hw):
    x = x_ref[...]                                            # (Bt, C, HW)
    # Global average pool: lane-axis sum in f32 (XLU), scaled by 1/HW.
    gap = jnp.sum(x.astype(jnp.float32), axis=-1) * inv_hw    # (Bt, C)
    # Tiny MLP on the MXU: (Bt,C)@(C,Cr) -> ReLU -> (Bt,Cr)@(Cr,C)
    h = jnp.dot(gap, w1_ref[...], preferred_element_type=jnp.float32) + b1_ref[...]
    h = jnp.maximum(h, 0.0)
    f = jnp.dot(h, w2_ref[...], preferred_element_type=jnp.float32) + b2_ref[...]
    att = jax.nn.sigmoid(f)                                   # (Bt, C) f32
    # Broadcast multiply in the input dtype (avoids upcasting the whole block
    # for bf16 inputs on v6e/v7x; identical math for f32 inputs).
    # TODO(synk): on v5e (no bf16 VPU) keep the multiply in f32 for bf16 inputs.
    o_ref[...] = (x * att.astype(x.dtype)[:, :, None]).astype(o_ref.dtype)


# -----------------------------------------------------------------------------
# Two-pass fallback (large C*HW):
#   pass 1: reduce GAP over HW tiles, finalize MLP+sigmoid -> attention (B, C)
#   pass 2: scale x tile-by-tile with the precomputed attention.
# -----------------------------------------------------------------------------
def _ca_gap_att_kernel(x_ref, w1_ref, b1_ref, w2_ref, b2_ref, att_ref, *,
                       inv_hw, hw, hwt, mask_tail):
    t = pl.program_id(1)

    @pl.when(t == 0)
    def _():
        att_ref[...] = jnp.zeros_like(att_ref)

    x = x_ref[...].astype(jnp.float32)                        # (Bt, C, HWt)
    if mask_tail:
        # Tail HW tile: zero out lanes beyond the valid spatial extent so the
        # undefined (out-of-bounds) lane values never pollute the sum.
        lane = jax.lax.broadcasted_iota(jnp.int32, x.shape, 2)
        valid = hw - t * hwt
        x = jnp.where(lane < valid, x, 0.0)
    att_ref[...] += jnp.sum(x, axis=-1)

    @pl.when(t == pl.num_programs(1) - 1)
    def _():
        gap = att_ref[...] * inv_hw                           # (Bt, C)
        h = jnp.dot(gap, w1_ref[...], preferred_element_type=jnp.float32) + b1_ref[...]
        h = jnp.maximum(h, 0.0)
        f = jnp.dot(h, w2_ref[...], preferred_element_type=jnp.float32) + b2_ref[...]
        att_ref[...] = jax.nn.sigmoid(f)


def _ca_apply_kernel(att_ref, x_ref, o_ref):
    att = att_ref[...]                                        # (Bt, C) f32
    x = x_ref[...]
    o_ref[...] = (x * att.astype(x.dtype)[:, :, None]).astype(o_ref.dtype)


# -----------------------------------------------------------------------------
# Wrapper
# -----------------------------------------------------------------------------
def channel_attention(x, w1, b1, w2, b2, *, single_pass_vmem_budget=48 * 1024 * 1024):
    """x: (B, C, H, W). w1: (C, Cr), b1: (Cr,), w2: (Cr, C), b2: (C,).

    Weights are stored (in, out), i.e. y = x @ W + b, matching the PyTorch
    Linear forward with W = weight.T.

    `single_pass_vmem_budget` gates the fused single-pass path (double-buffered
    input + output blocks + weights must fit); sized for v7x's 64 MiB VMEM by
    default, also valid on v5e/v6e (128 MiB).
    """
    B, C, H, W = x.shape
    HW = H * W
    Cr = w1.shape[1]
    itemsize = x.dtype.itemsize
    inv_hw = 1.0 / float(HW)

    Bt = B if B < 8 else 8
    nb = pl.cdiv(B, Bt)

    w1 = w1.astype(jnp.float32)
    w2 = w2.astype(jnp.float32)
    b1_2d = b1.reshape(1, Cr).astype(jnp.float32)
    b2_2d = b2.reshape(1, C).astype(jnp.float32)
    weight_bytes = int((w1.size + w2.size + b1_2d.size + b2_2d.size) * 4)

    x_flat = x.reshape(B, C, HW)

    # Physical VMEM footprint of one (Bt, C, HW) tile (sublane/lane padded).
    c_pad = _round_up(C, _SUBLANE)
    hw_pad = _round_up(HW, _LANE)
    block_bytes_1p = Bt * c_pad * hw_pad * itemsize
    fits_single_pass = 4 * block_bytes_1p + 2 * weight_bytes <= single_pass_vmem_budget

    if fits_single_pass:
        cost = pl.CostEstimate(
            flops=int(4 * B * C * Cr + 2 * B * C * HW),
            transcendentals=int(B * C),
            bytes_accessed=int(2 * B * C * HW * itemsize + weight_bytes),
        )
        vmem_limit = min(
            max(4 * block_bytes_1p + 2 * weight_bytes + (4 << 20), 32 << 20),
            128 << 20)
        out_flat = pl.pallas_call(
            functools.partial(_ca_single_pass_kernel, inv_hw=inv_hw),
            out_shape=jax.ShapeDtypeStruct((B, C, HW), x.dtype),
            grid_spec=pltpu.PrefetchScalarGridSpec(
                num_scalar_prefetch=0,
                grid=(nb,),
                in_specs=[
                    pl.BlockSpec((Bt, C, HW), lambda b: (b, 0, 0)),
                    pl.BlockSpec((C, Cr), lambda b: (0, 0)),   # VMEM-resident
                    pl.BlockSpec((1, Cr), lambda b: (0, 0)),
                    pl.BlockSpec((Cr, C), lambda b: (0, 0)),
                    pl.BlockSpec((1, C), lambda b: (0, 0)),
                ],
                out_specs=pl.BlockSpec((Bt, C, HW), lambda b: (b, 0, 0)),
            ),
            compiler_params=pltpu.CompilerParams(
                dimension_semantics=("parallel",),
                vmem_limit_bytes=int(vmem_limit),
            ),
            cost_estimate=cost,
        )(x_flat, w1, b1_2d, w2, b2_2d)
        return out_flat.reshape(B, C, H, W)

    # ---- Two-pass path: small lane-dense tiles, no wrapper-side pad copy. ----
    per_lane_bytes = max(Bt * c_pad * itemsize, 1)
    hwt = (single_pass_vmem_budget // 4) // per_lane_bytes
    hwt = max(_LANE, (hwt // _LANE) * _LANE)
    hwt = min(hwt, hw_pad)
    nt = pl.cdiv(HW, hwt)
    mask_tail = (HW % hwt) != 0

    # Pass 1: GAP reduce over HW tiles, finalize MLP + sigmoid -> (B, C) f32.
    att_cost = pl.CostEstimate(
        flops=int(B * C * HW + 4 * B * C * Cr),
        transcendentals=int(B * C),
        bytes_accessed=int(B * C * HW * itemsize + B * C * 4 + weight_bytes),
    )
    att_vmem = min(
        max(2 * Bt * c_pad * hwt * itemsize + 2 * weight_bytes
            + Bt * c_pad * 4 + (4 << 20), 32 << 20),
        128 << 20)
    att = pl.pallas_call(
        functools.partial(_ca_gap_att_kernel, inv_hw=inv_hw, hw=HW, hwt=hwt,
                          mask_tail=mask_tail),
        out_shape=jax.ShapeDtypeStruct((B, C), jnp.float32),
        grid_spec=pltpu.PrefetchScalarGridSpec(
            num_scalar_prefetch=0,
            grid=(nb, nt),
            in_specs=[
                pl.BlockSpec((Bt, C, hwt), lambda b, t: (b, 0, t)),
                pl.BlockSpec((C, Cr), lambda b, t: (0, 0)),
                pl.BlockSpec((1, Cr), lambda b, t: (0, 0)),
                pl.BlockSpec((Cr, C), lambda b, t: (0, 0)),
                pl.BlockSpec((1, C), lambda b, t: (0, 0)),
            ],
            out_specs=pl.BlockSpec((Bt, C), lambda b, t: (b, 0)),
        ),
        compiler_params=pltpu.CompilerParams(
            dimension_semantics=("parallel", "arbitrary"),
            vmem_limit_bytes=int(att_vmem),
        ),
        cost_estimate=att_cost,
    )(x_flat, w1, b1_2d, w2, b2_2d)

    # Pass 2: scale each (Bt, C, HWt) tile by the precomputed attention.
    apply_cost = pl.CostEstimate(
        flops=int(B * C * HW),
        transcendentals=0,
        bytes_accessed=int(2 * B * C * HW * itemsize + B * C * 4),
    )
    apply_vmem = min(
        max(4 * Bt * c_pad * hwt * itemsize + 2 * Bt * c_pad * 4 + (4 << 20),
            32 << 20),
        128 << 20)
    out_flat = pl.pallas_call(
        _ca_apply_kernel,
        out_shape=jax.ShapeDtypeStruct((B, C, HW), x.dtype),
        grid_spec=pltpu.PrefetchScalarGridSpec(
            num_scalar_prefetch=0,
            grid=(nb, nt),
            in_specs=[
                pl.BlockSpec((Bt, C), lambda b, t: (b, 0)),
                pl.BlockSpec((Bt, C, hwt), lambda b, t: (b, 0, t)),
            ],
            out_specs=pl.BlockSpec((Bt, C, hwt), lambda b, t: (b, 0, t)),
        ),
        compiler_params=pltpu.CompilerParams(
            dimension_semantics=("parallel", "parallel"),
            vmem_limit_bytes=int(apply_vmem),
        ),
        cost_estimate=apply_cost,
    )(att, x_flat)
    return out_flat.reshape(B, C, H, W)


def channel_attention_ref(x, w1, b1, w2, b2):
    """Pure-JAX reference mirroring the PyTorch forward."""
    B, C, H, W = x.shape
    gap = jnp.mean(x, axis=(2, 3))                       # (B, C)
    h = jnp.maximum(gap @ w1 + b1, 0.0)                  # (B, Cr)
    f = h @ w2 + b2                                      # (B, C)
    att = jax.nn.sigmoid(f).reshape(B, C, 1, 1)
    return x * att


if __name__ == "__main__":
    # Shapes consistent with the module: num_chans=64, reduction=16 -> hidden=4.
    B, C, H, W = 2, 64, 16, 16
    reduction = 16
    Cr = C // reduction

    key = jax.random.PRNGKey(0)
    kx, k1, k2, k3, k4 = jax.random.split(key, 5)

    x = jax.random.normal(kx, (B, C, H, W), dtype=jnp.float32)
    # Parameters stored as (in, out); equivalent to PyTorch's y = x @ W.T + b.
    w1 = jax.random.normal(k1, (C, Cr), dtype=jnp.float32) * 0.1
    b1 = jax.random.normal(k2, (Cr,), dtype=jnp.float32) * 0.1
    w2 = jax.random.normal(k3, (Cr, C), dtype=jnp.float32) * 0.1
    b2 = jax.random.normal(k4, (C,), dtype=jnp.float32) * 0.1

    ref = channel_attention_ref(x, w1, b1, w2, b2)

    # 1) Fused single-pass path (default for VMEM-friendly spatial sizes).
    out = jax.block_until_ready(channel_attention(x, w1, b1, w2, b2))
    assert out.shape == (B, C, H, W)
    assert jnp.allclose(out, ref, atol=1e-5, rtol=1e-5), "single-pass mismatch"

    # 2) Two-pass (GAP/MLP reduce + apply) fallback, forced via a tiny budget —
    #    the path large-HW inputs take on v7x's 64 MiB VMEM.
    out2 = jax.block_until_ready(
        channel_attention(x, w1, b1, w2, b2, single_pass_vmem_budget=1))
    assert jnp.allclose(out2, ref, atol=1e-5, rtol=1e-5), "two-pass mismatch"

    # 3) Non-128-multiple spatial size, single-pass (full-HW block, no pad copy).
    x3 = jax.random.normal(kx, (3, C, 14, 14), dtype=jnp.float32)
    ref3 = channel_attention_ref(x3, w1, b1, w2, b2)
    out3 = jax.block_until_ready(channel_attention(x3, w1, b1, w2, b2))
    assert jnp.allclose(out3, ref3, atol=1e-5, rtol=1e-5), "non-aligned HW mismatch"

    # 4) Non-128-multiple spatial size, forced two-pass (exercises the
    #    tail-lane masking in the GAP reduction).
    out4 = jax.block_until_ready(
        channel_attention(x3, w1, b1, w2, b2, single_pass_vmem_budget=1))
    assert jnp.allclose(out4, ref3, atol=1e-5, rtol=1e-5), "masked-tail mismatch"

    print("KERNEL_OK")
</pallas_src>

<mosaic_0001>
module attributes {stable_mosaic.version = 11 : i64} {
  func.func @_ca_single_pass_kernel(%arg0: i32, %arg1: memref<2x64x256xf32, #tpu.memory_space<vmem>>, %arg2: memref<64x4xf32, #tpu.memory_space<vmem>>, %arg3: memref<1x4xf32, #tpu.memory_space<vmem>>, %arg4: memref<4x64xf32, #tpu.memory_space<vmem>>, %arg5: memref<1x64xf32, #tpu.memory_space<vmem>>, %arg6: memref<2x64x256xf32, #tpu.memory_space<vmem>>) attributes {dimension_semantics = [#tpu.dimension_semantics<parallel>], iteration_bounds = array<i64: 1>, scalar_prefetch = 0 : i64, scratch_operands = 0 : i64, tpu.core_type = #tpu.core_type<tc>, window_params = [{transform_indices = @transform_0, window_bounds = array<i64: 2, 64, 256>}, {pipeline_mode = #tpu.pipeline_mode<synchronous>, transform_indices = @transform_1, window_bounds = array<i64: 64, 4>}, {pipeline_mode = #tpu.pipeline_mode<synchronous>, transform_indices = @transform_2, window_bounds = array<i64: 1, 4>}, {pipeline_mode = #tpu.pipeline_mode<synchronous>, transform_indices = @transform_3, window_bounds = array<i64: 4, 64>}, {pipeline_mode = #tpu.pipeline_mode<synchronous>, transform_indices = @transform_4, window_bounds = array<i64: 1, 64>}, {transform_indices = @transform_5, window_bounds = array<i64: 2, 64, 256>}]} {
    %c0 = arith.constant 0 : index
    %c0_0 = arith.constant 0 : index
    %c0_1 = arith.constant 0 : index
    %0 = vector.load %arg1[%c0, %c0_0, %c0_1] : memref<2x64x256xf32, #tpu.memory_space<vmem>>, vector<2x64x256xf32>
    %cst = arith.constant dense<0.000000e+00> : vector<2x64xf32>
    %1 = vector.multi_reduction <add>, %0, %cst [2] : vector<2x64x256xf32> to vector<2x64xf32>
    %cst_2 = arith.constant 3.906250e-03 : f32
    %2 = vector.broadcast %cst_2 : f32 to vector<2x64xf32>
    %3 = arith.mulf %1, %2 : vector<2x64xf32>
    %c0_3 = arith.constant 0 : index
    %c0_4 = arith.constant 0 : index
    %4 = vector.load %arg2[%c0_3, %c0_4] : memref<64x4xf32, #tpu.memory_space<vmem>>, vector<64x4xf32>
    %cst_5 = arith.constant dense<0.000000e+00> : vector<2x4xf32>
    %5 = tpu.matmul %3, %4, %cst_5 {dimension_numbers = #tpu.dot_dimension_numbers<[1], [0], [0], [1], [0, 0, 1, 1], [], []>} : vector<2x64xf32>, vector<64x4xf32>, vector<2x4xf32> -> vector<2x4xf32>
    %c0_6 = arith.constant 0 : index
    %c0_7 = arith.constant 0 : index
    %6 = vector.load %arg3[%c0_6, %c0_7] : memref<1x4xf32, #tpu.memory_space<vmem>>, vector<1x4xf32>
    %7 = vector.broadcast %6 : vector<1x4xf32> to vector<2x4xf32>
    %8 = arith.addf %5, %7 : vector<2x4xf32>
    %cst_8 = arith.constant 0.000000e+00 : f32
    %9 = vector.broadcast %cst_8 : f32 to vector<2x4xf32>
    %10 = arith.maximumf %8, %9 : vector<2x4xf32>
    %c0_9 = arith.constant 0 : index
    %c0_10 = arith.constant 0 : index
    %11 = vector.load %arg4[%c0_9, %c0_10] : memref<4x64xf32, #tpu.memory_space<vmem>>, vector<4x64xf32>
    %cst_11 = arith.constant dense<0.000000e+00> : vector<2x64xf32>
    %12 = tpu.matmul %10, %11, %cst_11 {dimension_numbers = #tpu.dot_dimension_numbers<[1], [0], [0], [1], [0, 0, 1, 1], [], []>} : vector<2x4xf32>, vector<4x64xf32>, vector<2x64xf32> -> vector<2x64xf32>
    %c0_12 = arith.constant 0 : index
    %c0_13 = arith.constant 0 : index
    %13 = vector.load %arg5[%c0_12, %c0_13] : memref<1x64xf32, #tpu.memory_space<vmem>>, vector<1x64xf32>
    %14 = vector.broadcast %13 : vector<1x64xf32> to vector<2x64xf32>
    %15 = arith.addf %12, %14 : vector<2x64xf32>
    %16 = arith.negf %15 : vector<2x64xf32>
    %17 = math.exp %16 : vector<2x64xf32>
    %cst_14 = arith.constant 1.000000e+00 : f32
    %18 = vector.broadcast %cst_14 : f32 to vector<2x64xf32>
    %19 = arith.addf %18, %17 : vector<2x64xf32>
    %20 = arith.divf %18, %19 : vector<2x64xf32>
    %21 = vector.shape_cast %20 : vector<2x64xf32> to vector<2x64x1xf32>
    %22 = vector.broadcast %21 : vector<2x64x1xf32> to vector<2x64x256xf32>
    %23 = arith.mulf %0, %22 : vector<2x64x256xf32>
    %c0_15 = arith.constant 0 : index
    %c0_16 = arith.constant 0 : index
    %c0_17 = arith.constant 0 : index
    %24 = vector.load %arg6[%c0_15, %c0_16, %c0_17] : memref<2x64x256xf32, #tpu.memory_space<vmem>>, vector<2x64x256xf32>
    tpu.vector_store %arg6[%c0_15, %c0_16, %c0_17], %23 {strides = array<i32>} : memref<2x64x256xf32, #tpu.memory_space<vmem>>, vector<2x64x256xf32>,
    return
  }
  func.func @transform_0(%arg0: i32) -> (i32, i32, i32) {
    %c0_i32 = arith.constant 0 : i32
    %c0_i32_0 = arith.constant 0 : i32
    %c0_i32_1 = arith.constant 0 : i32
    return %arg0, %c0_i32, %c0_i32_0 : i32, i32, i32
  }
  func.func @transform_1(%arg0: i32) -> (i32, i32) {
    %c0_i32 = arith.constant 0 : i32
    %c0_i32_0 = arith.constant 0 : i32
    %c0_i32_1 = arith.constant 0 : i32
    return %c0_i32, %c0_i32_0 : i32, i32
  }
  func.func @transform_2(%arg0: i32) -> (i32, i32) {
    %c0_i32 = arith.constant 0 : i32
    %c0_i32_0 = arith.constant 0 : i32
    %c0_i32_1 = arith.constant 0 : i32
    return %c0_i32, %c0_i32_0 : i32, i32
  }
  func.func @transform_3(%arg0: i32) -> (i32, i32) {
    %c0_i32 = arith.constant 0 : i32
    %c0_i32_0 = arith.constant 0 : i32
    %c0_i32_1 = arith.constant 0 : i32
    return %c0_i32, %c0_i32_0 : i32, i32
  }
  func.func @transform_4(%arg0: i32) -> (i32, i32) {
    %c0_i32 = arith.constant 0 : i32
    %c0_i32_0 = arith.constant 0 : i32
    %c0_i32_1 = arith.constant 0 : i32
    return %c0_i32, %c0_i32_0 : i32, i32
  }
  func.func @transform_5(%arg0: i32) -> (i32, i32, i32) {
    %c0_i32 = arith.constant 0 : i32
    %c0_i32_0 = arith.constant 0 : i32
    %c0_i32_1 = arith.constant 0 : i32
    return %arg0, %c0_i32, %c0_i32_0 : i32, i32, i32
  }
}

</mosaic_0001>

<bundles_post_ra>
// kernel: tpu_custom_call.1
= control target key start
LH: loop header
LB: loop body
LE: loop exit
PB: predicated region body
PF: predicated region fallthrough
CT: control target
= control target key end

     0   :  { %10 = vsyncpa [#allocation3], 0  ;;  %s766_s0 = inlined_call_operand.hbm [shape: f32[2,64,256], index: 0, kind: input, shape index: {}]   ;;  %s767_s1 = inlined_call_operand.vmem [shape: f32[64,4], index: 1, kind: input, shape index: {}]   ;;  %s768_s2 = inlined_call_operand.vmem [shape: f32[1,4], index: 2, kind: input, shape index: {}]   ;;  %s769_s3 = inlined_call_operand.vmem [shape: f32[4,64], index: 3, kind: input, shape index: {}]   ;;  %s770_s4 = inlined_call_operand.vmem [shape: f32[1,64], index: 4, kind: input, shape index: {}]   ;;  %s771_s5 = inlined_call_operand.hbm [shape: f32[2,64,256], index: 5, kind: output, shape index: {}]  }
   0x1   :  { %11 = vsyncpa [#allocation4], 0  ;;  %s16_s20 = sshll.u32 %s766_s0, 4  ;;  %s549_s21 = smov [#allocation2]   ;;  %s17_s20 = int_to_ptr.hbm [resolvable:$true] %s16_s20 }
   0x2   :  { %s18_s22 = sshll.u32 %s549_s21, 4  ;;  %s550_s23 = smov 256   ;;  %s19_s22 = int_to_ptr.vmem [resolvable:$true] %s18_s22 }
   0x3   :  { %s551_s24 = smov 16  }
   0x4   :  { %24 = dma.hbm_to_vmem [thread:$0]  %s17_s20, 4096, %s19_s22, [#allocation3], %s550_s23, %s550_s23, %s551_s24  }
   0x5   :  { %545 = dma.done.wait [#allocation3], 4096  }
   0x6   :  { %546 = vsyncadd [#allocation3], 4294963200  ;;  %v589_v0 = vld [vmem:[#allocation2 + $0x80] sm:$0xff]  ;;  %v591_v1 = vld [vmem:[#allocation2 + $0x88] sm:$0xff]  ;;  %vm166_vm0 = vcmask 130112   ;;  %vm170_vm1 = vcmask 195712  }
   0x7   :  { %v593_v2 = vld [vmem:[#allocation2] sm:$0xff]  ;;  %v93_v3 = vadd.f32 %v591_v1, %v589_v0  ;;  %v597_v4 = vld [vmem:[#allocation2 + $0x8] sm:$0xff]  ;;  %v607_v9 = vld [vmem:[#allocation2 + $0x90] sm:$0xff]  ;;  %vm174_vm2 = vcmask 261312   ;;  %vm178_vm3 = vcmask 326912   ;;  %vm182_vm4 = vcmask 392512  }
   0x8   :  { %v599_v5 = vld [vmem:[#allocation2 + $0x20] sm:$0xff]  ;;  %v601_v6 = vld [vmem:[#allocation2 + $0x28] sm:$0xff]  ;;  %v69_v7 = vadd.f32 %v597_v4, %v593_v2  ;;  %v609_v10 = vld [vmem:[#allocation2 + $0x98] sm:$0xff]  ;;  %vm186_vm5 = vcmask 458112   ;;  %vm190_vm6 = vcmask 523712   ;;  %vm207_vm7 = vcmask 1041409  }
   0x9   :  { %v75_v8 = vadd.f32 %v601_v6, %v599_v5  ;;  %94 = vadd.xlane.f32.xlu1 %v93_v3  ;;  %v611_v11 = vld [vmem:[#allocation2 + $0x10] sm:$0xff]  ;;  %v613_v12 = vld [vmem:[#allocation2 + $0x18] sm:$0xff]  ;;  %v615_v13 = vld [vmem:[#allocation2 + $0xa0] sm:$0xff]  ;;  %v96_v15 = vadd.f32 %v609_v10, %v607_v9  ;;  %vm209_vm8 = vcmask 523264   ;;  %vm242_vm9 = vcmask 1043456   ;;  %s453_s21 = sshll.u32 %s771_s5, 4  ;;  %s454_s21 = int_to_ptr.hbm [resolvable:$true] %s453_s21 }
   0xa   :  { %70 = vadd.xlane.f32.xlu0 %v69_v7  ;;  %v617_v14 = vld [vmem:[#allocation2 + $0xa8] sm:$0xff]  ;;  %v72_v16 = vadd.f32 %v613_v12, %v611_v11  ;;  %v625_v18 = vld [vmem:[#allocation2 + $0xb0] sm:$0xff]  ;;  %v627_v19 = vld [vmem:[#allocation2 + $0xb8] sm:$0xff]  ;;  %v772_v7 = vlaneseq  ;;  %vm238_vm10 = vcmask 31744  }
   0xb   :  { %76 = vadd.xlane.f32.xlu2 %v75_v8  ;;  %v99_v17 = vadd.f32 %v617_v14, %v615_v13  ;;  %v629_v20 = vld [vmem:[#allocation2 + $0x30] sm:$0xff]  ;;  %v631_v21 = vld [vmem:[#allocation2 + $0x38] sm:$0xff]  ;;  %v633_v22 = vld [vmem:[#allocation2 + $0x40] sm:$0xff]  ;;  %v102_v24 = vadd.f32 %v627_v19, %v625_v18 }
   0xc   :  { %v635_v23 = vld [vmem:[#allocation2 + $0x48] sm:$0xff]  ;;  %v78_v25 = vadd.f32 %v631_v21, %v629_v20  ;;  %v643_v27 = vld [vmem:[#allocation2 + $0x50] sm:$0xff]  ;;  %v645_v28 = vld [vmem:[#allocation2 + $0x58] sm:$0xff]  ;;  %v162_v8 = vand.u32 127, %v772_v7 }
   0xd   :  { %v81_v26 = vadd.f32 %v635_v23, %v633_v22  ;;  %v647_v29 = vld [vmem:[#allocation2 + $0xc0] sm:$0xff]  ;;  %v649_v30 = vld [vmem:[#allocation2 + $0xc8] sm:$0xff]  ;;  %v651_v31 = vld [vmem:[#allocation2 + $0xd0] sm:$0xff]  ;;  %v84_v33 = vadd.f32 %v645_v28, %v643_v27 }
   0xe   :  { %775 = vst [vmem:[#allocation8_spill] sm:$0xff] %v651_v31  ;;  %v653_v32 = vld [vmem:[#allocation2 + $0xd8] sm:$0xff]  ;;  %v105_v34 = vadd.f32 %v649_v30, %v647_v29  ;;  %v661_v36 = vld [vmem:[#allocation2 + $0xe0] sm:$0xff]  ;;  %v663_v37 = vld [vmem:[#allocation2 + $0xe8] sm:$0xff] }
   0xf   :  { %776 = vst [vmem:[#allocation9_spill] sm:$0xff] %v653_v32  ;;  %v108_v35 = vadd.f32 %v653_v32, %v651_v31  ;;  %v665_v38 = vld [vmem:[#allocation2 + $0x60] sm:$0xff]  ;;  %v667_v39 = vld [vmem:[#allocation2 + $0x68] sm:$0xff]  ;;  %v669_v40 = vld [vmem:[#allocation2 + $0x70] sm:$0xff]  ;;  %v111_v42 = vadd.f32 %v663_v37, %v661_v36 }
  0x10   :  { %v671_v41 = vld [vmem:[#allocation2 + $0x78] sm:$0xff]  ;;  %v87_v43 = vadd.f32 %v667_v39, %v665_v38  ;;  %v679_v45 = vld [vmem:[#allocation2 + $0xf0] sm:$0xff]  ;;  %v138_v53 = vld [vmem:[%s767_s1 + $0x28] sm:$0xff] }
  0x11   :  { %97 = vadd.xlane.f32.xlu1 %v96_v15  ;;  %v90_v44 = vadd.f32 %v671_v41, %v669_v40  ;;  %v681_v46 = vld [vmem:[#allocation2 + $0xf8] sm:$0xff]  ;;  %v139_v52 = vld [vmem:[%s767_s1 + $0x30] sm:$0xff]  ;;  %v137_v54 = vld [vmem:[%s767_s1 + $0x20] sm:$0xff] }
  0x12   :  { %73 = vadd.xlane.f32.xlu0 %v72_v16  ;;  %v114_v47 = vadd.f32 %v681_v46, %v679_v45  ;;  %v140_v48 = vld [vmem:[%s767_s1 + $0x38] sm:$0xff]  ;;  %v135_v59 = vld [vmem:[%s767_s1 + $0x10] sm:$0xff]  ;;  %v134_v60 = vld [vmem:[%s767_s1 + $0x8] sm:$0xff] }
  0x13   :  { %100 = vadd.xlane.f32.xlu2 %v99_v17  ;;  %220 = vmatpush.msra.mxu0 %v140_v48  ;;  %v136_v55 = vld [vmem:[%s767_s1 + $0x18] sm:$0xff]  ;;  %v133_v61 = vld [vmem:[%s767_s1] sm:$0xff] }
  0x15   :  { %221 = vmatpush.msra.mxu0 %v139_v52 }
  0x17   :  { %222 = vmatpush.msra.mxu0 %v138_v53 }
  0x19   :  { %103 = vadd.xlane.f32.xlu1 %v102_v24  ;;  %223 = vmatpush.msra.mxu0 %v137_v54  ;;  %v164_v24 = vadd.s32 4294967288, %v162_v8 }
  0x1a   :  { %79 = vadd.xlane.f32.xlu0 %v78_v25 }
  0x1b   :  { %82 = vadd.xlane.f32.xlu2 %v81_v26  ;;  %224 = vmatpush.msra.mxu0 %v136_v55 }
  0x1d   :  { %225 = vmatpush.msra.mxu0 %v135_v59 }
  0x1f   :  { %226 = vmatpush.msra.mxu0 %v134_v60  ;;  %v176_v60 = vadd.s32 4294967264, %v162_v8 }
  0x21   :  { %85 = vadd.xlane.f32.xlu1 %v84_v33  ;;  %227 = vmatpush.msra.mxu0 %v133_v61 }
  0x22   :  { %106 = vadd.xlane.f32.xlu0 %v105_v34 }
  0x23   :  { %109 = vadd.xlane.f32.xlu2 %v108_v35  ;;  %v168_v35 = vadd.s32 4294967280, %v162_v8 }
  0x29   :  { %112 = vadd.xlane.f32.xlu1 %v111_v42 }
  0x2a   :  { %88 = vadd.xlane.f32.xlu0 %v87_v43 }
  0x2b   :  { %91 = vadd.xlane.f32.xlu2 %v90_v44  ;;  %v172_v44 = vadd.s32 4294967272, %v162_v8 }
  0x32   :  { %115 = vadd.xlane.f32.xlu0 %v114_v47 }
  0x7c   :  { %v95_v49 = vpop.xlane.xlu1 %94 }
  0x7d   :  { %v71_v50 = vpop.xlane.xlu0 %70  ;;  %v125_v26 = vmul.f32 0.00390625, %v95_v49 }
  0x7e   :  { %v77_v51 = vpop.xlane.xlu2 %76  ;;  %v117_v33 = vmul.f32 0.00390625, %v71_v50 }
  0x7f   :  { %v119_v42 = vmul.f32 0.00390625, %v77_v51  ;;  %v192_v52 = vperm.slane %v125_v26, %v162_v8 }
  0x80   :  { %v163_v53 = vperm.slane %v117_v33, %v162_v8 }
  0x81   :  { %v169_v59 = vperm.slane %v119_v42, %v168_v35 }
  0x84   :  { %v98_v56 = vpop.xlane.xlu1 %97 }
  0x85   :  { %v74_v57 = vpop.xlane.xlu0 %73  ;;  %v126_v34 = vmul.f32 0.00390625, %v98_v56  ;;  %v180_v56 = vadd.s32 4294967256, %v162_v8 }
  0x86   :  { %v101_v58 = vpop.xlane.xlu2 %100  ;;  %v118_v25 = vmul.f32 0.00390625, %v74_v57 }
  0x87   :  { %v127_v48 = vmul.f32 0.00390625, %v101_v58  ;;  %v193_v54 = vperm.slane %v126_v34, %v164_v24 }
  0x88   :  { %v165_v43 = vperm.slane %v118_v25, %v164_v24 }
  0x89   :  { %v195_v32 = vperm.slane %v127_v48, %v168_v35  ;;  %v194_v26 = vsel %vm166_vm0, %v193_v54, %v192_v52 }
  0x8a   :  { %v167_v49 = vsel %vm166_vm0, %v165_v43, %v163_v53 }
  0x8b   :  { %v196_v35 = vsel %vm170_vm1, %v195_v32, %v194_v26  ;;  %v777_v26 = vlaneseq }
  0x8c   :  { %v104_v62 = vpop.xlane.xlu1 %103 }
  0x8d   :  { %v80_v63 = vpop.xlane.xlu0 %79  ;;  %v128_v55 = vmul.f32 0.00390625, %v104_v62 }
  0x8e   :  { %v83_v3 = vpop.xlane.xlu2 %82  ;;  %v120_v47 = vmul.f32 0.00390625, %v80_v63  ;;  %v184_v63 = vadd.s32 4294967248, %v162_v8 }
  0x8f   :  { %v121_v61 = vmul.f32 0.00390625, %v83_v3  ;;  %v197_v24 = vperm.slane %v128_v55, %v172_v44  ;;  %v171_v3 = vsel %vm170_vm1, %v169_v59, %v167_v49 }
  0x90   :  { %v173_v50 = vperm.slane %v120_v47, %v172_v44 }
  0x91   :  { %v198_v53 = vsel %vm174_vm2, %v197_v24, %v196_v35  ;;  %v287_v24 = vshrl.u32 %v777_v26, 7 }
  0x92   :  { %v175_v42 = vsel %vm174_vm2, %v173_v50, %v171_v3 }
  0x93   :  { %474 = vset.pattern.permute.xlu1 %v287_v24  ;;  %v294_v3 = vadd.s32 8, %v287_v24 }
  0x94   :  { %v86_v15 = vpop.xlane.xlu1 %85 }
  0x95   :  { %v107_v16 = vpop.xlane.xlu0 %106  ;;  %v122_v51 = vmul.f32 0.00390625, %v86_v15  ;;  %v188_v15 = vadd.s32 4294967240, %v162_v8  ;;  %475 = vset.pattern.permute.xlu2 %v294_v3 }
  0x96   :  { %v110_v17 = vpop.xlane.xlu2 %109  ;;  %v129_v7 = vmul.f32 0.00390625, %v107_v16  ;;  %v177_v16 = vperm.slane %v121_v61, %v176_v60 }
  0x97   :  { %v130_v62 = vmul.f32 0.00390625, %v110_v17  ;;  %v181_v43 = vperm.slane %v122_v51, %v180_v56  ;;  %v491_v51 = vld [vmem:[%s768_s2] ss:$0 sm:$0xff]  ;;  %s552_s2 = smov [#allocation5]  }
  0x98   :  { %v199_v33 = vperm.slane %v129_v7, %v176_v60  ;;  %v179_v17 = vsel %vm178_vm3, %v177_v16, %v175_v42  ;;  %v492_v16 = vld [vmem:[%s770_s4] ss:$0 sm:$0xff]  ;;  %s451_s4 = sshll.u32 %s552_s2, 4  ;;  %s452_s4 = int_to_ptr.vmem [resolvable:$true] %s451_s4 }
  0x99   :  { %v201_v52 = vperm.slane %v130_v62, %v180_v56  ;;  %v183_v55 = vsel %vm182_vm4, %v181_v43, %v179_v17  ;;  %v233_v56 = vld [vmem:[%s769_s3] sm:$0xf]  ;;  %v300_v62 = vadd.s32 16, %v287_v24 }
  0x9a   :  { %v200_v44 = vsel %vm178_vm3, %v199_v33, %v198_v53  ;;  %467 = vmatpush.msk.msra.mxu1 %vm242_vm9, %v233_v56 }
  0x9b   :  { %v202_v8 = vsel %vm182_vm4, %v201_v52, %v200_v44  ;;  %476 = vset.pattern.permute.xlu0 %v300_v62 }
  0x9c   :  { %v113_v25 = vpop.xlane.xlu1 %112 }
  0x9d   :  { %v89_v57 = vpop.xlane.xlu0 %88  ;;  %v131_v34 = vmul.f32 0.00390625, %v113_v25 }
  0x9e   :  { %v123_v31 = vmul.f32 0.00390625, %v89_v57  ;;  %v92_v58 = vpop.xlane.xlu2 %91 }
  0x9f   :  { %v124_v47 = vmul.f32 0.00390625, %v92_v58  ;;  %v203_v54 = vperm.slane %v131_v34, %v184_v63 }
  0xa0   :  { %v185_v48 = vperm.slane %v123_v31, %v184_v63 }
  0xa1   :  { %v189_v59 = vperm.slane %v124_v47, %v188_v15  ;;  %v204_v32 = vsel %vm186_vm5, %v203_v54, %v202_v8 }
  0xa2   :  { %v187_v61 = vsel %vm186_vm5, %v185_v48, %v183_v55 }
  0xa3   :  { %v191_v31 = vsel %vm190_vm6, %v189_v59, %v187_v61  ;;  %v312_v61 = vadd.s32 32, %v287_v24 }
  0xa5   :  { %v116_v7 = vpop.xlane.xlu0 %115 }
  0xa6   :  { %v132_v60 = vmul.f32 0.00390625, %v116_v7 }
  0xa8   :  { %v205_v57 = vperm.slane %v132_v60, %v188_v15  ;;  %v306_v60 = vadd.s32 24, %v287_v24 }
  0xaa   :  { %v206_v49 = vsel %vm190_vm6, %v205_v57, %v204_v32  ;;  %v324_v57 = vadd.s32 48, %v287_v24  ;;  %v318_v32 = vadd.s32 40, %v287_v24 }
  0xab   :  { %v208_v50 = vsel %vm207_vm7, %v206_v49, %v191_v31  ;;  %v330_v31 = vadd.s32 56, %v287_v24 }
  0xac   :  { %466 = vmatmul.msk.f32.vlgmr.msra.gmra.mxu0 %vm209_vm8, %v208_v50 }
 0x129   :  { %v229_v25 = vpop.f32.mrf.mxu0 }
 0x12a   :  { %v230_v63 = vadd.f32 %v491_v51, %v229_v25 }
 0x12c   :  { %v232_v58 = vmax.f32 %v230_v63, 0.0 }
 0x12e   :  { %468 = vmatmul.msk.f32.vlgmr.msra.gmra.mxu1 %vm238_vm10, %v232_v58 }
 0x1ab   :  { %v263_v33 = vpop.f32.mrf.mxu1 }
 0x1ac   :  { %v264_v34 = vadd.f32 %v492_v16, %v263_v33 }
 0x1ae   :  { %v469_v42 = vmul.f32 -1.442695, %v264_v34 }
 0x1b0   :  { %493 = vpow2.f32 %v469_v42 }
 0x1b6   :  { %v494_v43 = vpop.eup %493 }
 0x1b7   :  { %v269_v15 = vadd.f32 1.0, %v494_v43 }
 0x1b9   :  { %495 = vrcp.f32 %v269_v15  ;;  %v281_v53 = vand.u32 2147483648, %v269_v15  ;;  %v279_v17 = vand.u32 2147483647, %v269_v15  ;;  %vm275_vm12 = vweird.f32 %v269_v15 }
 0x1bb   :  { %v282_v54 = vor.u32 1.1754944e-38, %v281_v53  ;;  %vm280_vm14 = vcmp.eq.f32.partialorder %v279_v17, 8.507059e+37 }
 0x1bf   :  { %v496_v47 = vpop.eup %495 }
 0x1c0   :  { %v271_v35 = vmul.f32 %v496_v47, %v269_v15  ;;  %vm276_vm11 = vweird.f32 %v496_v47 }
 0x1c1   :  { %vm277_vm13 = vmor %vm275_vm12, %vm276_vm11 }
 0x1c2   :  { %v272_v48 = vsub.f32 1.0, %v271_v35 }
 0x1c4   :  { %v273_v52 = vmul.f32 %v496_v47, %v272_v48 }
 0x1c6   :  { %v274_v44 = vadd.f32 %v496_v47, %v273_v52  ;;  %v779_v52 = vld [vmem:[#allocation9_spill] sm:$0xff] }
 0x1c8   :  { %v278_v7 = vsel %vm277_vm13, %v496_v47, %v274_v44 }
 0x1c9   :  { %v283_v55 = vsel %vm280_vm14, %v282_v54, %v278_v7 }
 0x1ca   :  { %v285_v59 = vperm.slane %v283_v55, 0  ;;  %v334_v8 = vperm.slane %v283_v55, 1 }
 0x1cc   :  { %302 = vperm.xlu0 %476, %v285_v59   ;;  %296 = vperm.xlu2 %475, %v285_v59  }
 0x1cd   :  { %290 = vperm.xlu1 %474, %v285_v59  }
 0x1d4   :  { %483 = vset.pattern.permute.xlu0 %v294_v3  ;;  %477 = vset.pattern.permute.xlu2 %v306_v60 }
 0x1d5   :  { %478 = vset.pattern.permute.xlu1 %v312_v61 }
 0x1dc   :  { %345 = vperm.xlu0 %483, %v334_v8   ;;  %308 = vperm.xlu2 %477, %v285_v59  }
 0x1dd   :  { %314 = vperm.xlu1 %478, %v285_v59  }
 0x1e4   :  { %488 = vset.pattern.permute.xlu0 %v324_v57  ;;  %479 = vset.pattern.permute.xlu2 %v318_v32 }
 0x1e5   :  { %480 = vset.pattern.permute.xlu1 %v324_v57 }
 0x1ec   :  { %375 = vperm.xlu0 %488, %v334_v8   ;;  %320 = vperm.xlu2 %479, %v285_v59  }
 0x1ed   :  { %326 = vperm.xlu1 %480, %v285_v59  }
 0x1f4   :  { %481 = vset.pattern.permute.xlu2 %v330_v31  ;;  %490 = vset.pattern.permute.xlu0 %v330_v31 }
 0x1f5   :  { %482 = vset.pattern.permute.xlu1 %v287_v24 }
 0x1fc   :  { %332 = vperm.xlu2 %481, %v285_v59  }
 0x1fd   :  { %339 = vperm.xlu1 %482, %v334_v8  }
 0x204   :  { %484 = vset.pattern.permute.xlu2 %v300_v62 }
 0x205   :  { %485 = vset.pattern.permute.xlu1 %v306_v60 }
 0x20c   :  { %351 = vperm.xlu2 %484, %v334_v8  }
 0x20d   :  { %357 = vperm.xlu1 %485, %v334_v8  }
 0x214   :  { %486 = vset.pattern.permute.xlu2 %v312_v61 }
 0x215   :  { %487 = vset.pattern.permute.xlu1 %v318_v32 }
 0x21c   :  { %363 = vperm.xlu2 %486, %v334_v8  }
 0x21d   :  { %369 = vperm.xlu1 %487, %v334_v8  }
 0x224   :  { %489 = vset.pattern.permute.xlu2 %v330_v31 }
 0x226   :  { %v297_v49 = vpop.permute.xlu2 %296 }
 0x227   :  { %v385_v50 = vmul.f32 %v297_v49, %v611_v11  ;;  %v386_v56 = vmul.f32 %v297_v49, %v613_v12 }
 0x229   :  { %417 = vst [vmem:[#allocation5 + $0x10] sm:$0xff] %v385_v50 }
 0x22a   :  { %418 = vst [vmem:[#allocation5 + $0x18] sm:$0xff] %v386_v56 }
 0x22c   :  { %381 = vperm.xlu2 %489, %v334_v8  }
 0x236   :  { %v309_v51 = vpop.permute.xlu2 %308 }
 0x237   :  { %v389_v25 = vmul.f32 %v309_v51, %v629_v20  ;;  %v390_v63 = vmul.f32 %v309_v51, %v631_v21 }
 0x239   :  { %421 = vst [vmem:[#allocation5 + $0x30] sm:$0xff] %v389_v25 }
 0x23a   :  { %422 = vst [vmem:[#allocation5 + $0x38] sm:$0xff] %v390_v63 }
 0x23e   :  { %v303_v58 = vpop.permute.xlu0 %302 }
 0x23f   :  { %v387_v26 = vmul.f32 %v303_v58, %v599_v5  ;;  %v388_v24 = vmul.f32 %v303_v58, %v601_v6  ;;  %v291_v62 = vpop.permute.xlu1 %290 }
 0x240   :  { %v383_v11 = vmul.f32 %v291_v62, %v593_v2  ;;  %v384_v12 = vmul.f32 %v291_v62, %v597_v4 }
 0x241   :  { %419 = vst [vmem:[#allocation5 + $0x20] sm:$0xff] %v387_v26 }
 0x242   :  { %420 = vst [vmem:[#allocation5 + $0x28] sm:$0xff] %v388_v24 }
 0x243   :  { %415 = vst [vmem:[#allocation5] sm:$0xff] %v383_v11 }
 0x244   :  { %416 = vst [vmem:[#allocation5 + $0x8] sm:$0xff] %v384_v12 }
 0x246   :  { %v321_v3 = vpop.permute.xlu2 %320 }
 0x247   :  { %v393_v20 = vmul.f32 %v321_v3, %v643_v27  ;;  %v394_v21 = vmul.f32 %v321_v3, %v645_v28 }
 0x249   :  { %425 = vst [vmem:[#allocation5 + $0x50] sm:$0xff] %v393_v20 }
 0x24a   :  { %426 = vst [vmem:[#allocation5 + $0x58] sm:$0xff] %v394_v21 }
 0x24e   :  { %v346_v16 = vpop.permute.xlu0 %345 }
 0x24f   :  { %v401_v5 = vmul.f32 %v346_v16, %v607_v9  ;;  %v402_v6 = vmul.f32 %v346_v16, %v609_v10  ;;  %v315_v33 = vpop.permute.xlu1 %314 }
 0x250   :  { %v391_v2 = vmul.f32 %v315_v33, %v633_v22  ;;  %v392_v4 = vmul.f32 %v315_v33, %v635_v23 }
 0x251   :  { %433 = vst [vmem:[#allocation5 + $0x90] sm:$0xff] %v401_v5 }
 0x252   :  { %434 = vst [vmem:[#allocation5 + $0x98] sm:$0xff] %v402_v6 }
 0x253   :  { %423 = vst [vmem:[#allocation5 + $0x40] sm:$0xff] %v391_v2 }
 0x254   :  { %424 = vst [vmem:[#allocation5 + $0x48] sm:$0xff] %v392_v4 }
 0x256   :  { %v333_v34 = vpop.permute.xlu2 %332 }
 0x257   :  { %v397_v27 = vmul.f32 %v333_v34, %v669_v40  ;;  %v398_v28 = vmul.f32 %v333_v34, %v671_v41 }
 0x259   :  { %429 = vst [vmem:[#allocation5 + $0x70] sm:$0xff] %v397_v27 }
 0x25a   :  { %430 = vst [vmem:[#allocation5 + $0x78] sm:$0xff] %v398_v28 }
 0x25e   :  { %v376_v42 = vpop.permute.xlu0 %375 }
 0x25f   :  { %v411_v9 = vmul.f32 %v376_v42, %v661_v36  ;;  %v412_v10 = vmul.f32 %v376_v42, %v663_v37  ;;  %v327_v43 = vpop.permute.xlu1 %326 }
 0x260   :  { %v395_v22 = vmul.f32 %v327_v43, %v665_v38  ;;  %v396_v23 = vmul.f32 %v327_v43, %v667_v39 }
 0x261   :  { %443 = vst [vmem:[#allocation5 + $0xe0] sm:$0xff] %v411_v9 }
 0x262   :  { %444 = vst [vmem:[#allocation5 + $0xe8] sm:$0xff] %v412_v10 }
 0x263   :  { %427 = vst [vmem:[#allocation5 + $0x60] sm:$0xff] %v395_v22 }
 0x264   :  { %428 = vst [vmem:[#allocation5 + $0x68] sm:$0xff] %v396_v23 }
 0x266   :  { %v352_v15 = vpop.permute.xlu2 %351 }
 0x267   :  { %v403_v40 = vmul.f32 %v352_v15, %v615_v13  ;;  %v404_v41 = vmul.f32 %v352_v15, %v617_v14 }
 0x269   :  { %435 = vst [vmem:[#allocation5 + $0xa0] sm:$0xff] %v403_v40 }
 0x26a   :  { %436 = vst [vmem:[#allocation5 + $0xa8] sm:$0xff] %v404_v41 }
 0x26f   :  { %v340_v47 = vpop.permute.xlu1 %339 }
 0x270   :  { %v399_v36 = vmul.f32 %v340_v47, %v589_v0  ;;  %v400_v37 = vmul.f32 %v340_v47, %v591_v1 }
 0x272   :  { %431 = vst [vmem:[#allocation5 + $0x80] sm:$0xff] %v399_v36 }
 0x273   :  { %432 = vst [vmem:[#allocation5 + $0x88] sm:$0xff] %v400_v37 }
 0x276   :  { %v364_v38 = vpop.permute.xlu2 %363 }
 0x277   :  { %v407_v39 = vmul.f32 %v364_v38, %v647_v29  ;;  %v408_v35 = vmul.f32 %v364_v38, %v649_v30  ;;  %v778_v30 = vld [vmem:[#allocation8_spill] sm:$0xff] }
 0x279   :  { %439 = vst [vmem:[#allocation5 + $0xc0] sm:$0xff] %v407_v39 }
 0x27a   :  { %440 = vst [vmem:[#allocation5 + $0xc8] sm:$0xff] %v408_v35 }
 0x27f   :  { %v358_v48 = vpop.permute.xlu1 %357 }
 0x280   :  { %v405_v13 = vmul.f32 %v358_v48, %v625_v18  ;;  %v406_v14 = vmul.f32 %v358_v48, %v627_v19 }
 0x282   :  { %437 = vst [vmem:[#allocation5 + $0xb0] sm:$0xff] %v405_v13 }
 0x283   :  { %438 = vst [vmem:[#allocation5 + $0xb8] sm:$0xff] %v406_v14 }
 0x286   :  { %v382_v53 = vpop.permute.xlu2 %381 }
 0x287   :  { %v413_v0 = vmul.f32 %v382_v53, %v679_v45  ;;  %v414_v1 = vmul.f32 %v382_v53, %v681_v46 }
 0x289   :  { %445 = vst [vmem:[#allocation5 + $0xf0] sm:$0xff] %v413_v0 }
 0x28a   :  { %446 = vst [vmem:[#allocation5 + $0xf8] sm:$0xff] %v414_v1 }
 0x28f   :  { %v370_v29 = vpop.permute.xlu1 %369 }
 0x290   :  { %v409_v18 = vmul.f32 %v370_v29, %v778_v30  ;;  %v410_v19 = vmul.f32 %v370_v29, %v779_v52 }
 0x292   :  { %441 = vst [vmem:[#allocation5 + $0xd0] sm:$0xff] %v409_v18 }
 0x293   :  { %442 = vst [vmem:[#allocation5 + $0xd8] sm:$0xff] %v410_v19 }
 0x294   :  { %459 = dma.vmem_to_hbm [thread:$0]  %s452_s4, 4096, %s454_s21, [#allocation4], %s550_s23, %s550_s23, %s551_s24  }
 0x295   :  { %547 = dma.done.wait [#allocation4], 4096  }
 0x296   :  { %548 = vsyncadd [#allocation4], 4294963200 }
 0x297   :  { %464 = vsyncpa [#allocation3], 1 }
 0x298   :  { %465 = vsyncpa [#allocation4], 1 }

</bundles_post_ra>
